<compile_context>
chip_gen: v7x
topology: tpu7x:2x2x1
jax: 0.10.0
libtpu: 0.0.40
codegen_flags: <defaults>
</compile_context>

<pallas_src>
import functools

import jax
import jax.numpy as jnp
from jax.experimental import pallas as pl
from jax.experimental.pallas import tpu as pltpu

_LANE = 128
_MIB = 1024 * 1024


def _round_up(n, m):
    return ((n + m - 1) // m) * m


def _cdiv(a, b):
    return (a + b - 1) // b


def _layernorm(x, gamma, beta, eps=1e-5):
    mu = jnp.mean(x, axis=-1, keepdims=True)
    var = jnp.mean(jnp.square(x - mu), axis=-1, keepdims=True)
    return (x - mu) * jax.lax.rsqrt(var + eps) * gamma + beta


# --------------------------------------------------------------------------- #
# Hardware / API introspection (best-effort, safe fallbacks)
# --------------------------------------------------------------------------- #
def _vmem_capacity_bytes():
    try:
        cap = int(getattr(pltpu.get_tpu_info(), "vmem_capacity_bytes"))
        if cap > 0:
            return cap
    except Exception:
        pass
    return 64 * _MIB  # conservative: v7x per-TensorCore VMEM


def _supports_single_buffering():
    try:
        pl.BlockSpec((8, _LANE), lambda i: (0, 0), pipeline_mode=pl.Buffered(1))
        return True
    except Exception:
        return False


def _cost_estimate(flops, bytes_accessed, transcendentals=0):
    try:
        return pl.CostEstimate(flops=int(flops),
                               transcendentals=int(transcendentals),
                               bytes_accessed=int(bytes_accessed))
    except Exception:
        return None


def _auto_tile(T, per_token_bytes, fixed_bytes, budget, user_tile):
    """Pick the token-tile size: biggest that fits the VMEM budget, >= 2 steps."""
    Tp8 = _round_up(max(T, 1), 8)
    if user_tile is not None:
        return min(max(8, _round_up(user_tile, 8)), Tp8)
    avail = budget - fixed_bytes - 2 * _MIB
    tile = max(8, (avail // max(per_token_bytes, 1)) // 8 * 8)
    tile = min(tile, 1024, Tp8)
    # Keep >= 2 grid steps: pipelining has something to overlap and the v7x
    # megacore can shard the "parallel" token axis across both TensorCores.
    if tile >= Tp8 and Tp8 >= 16:
        tile = _round_up(_cdiv(Tp8, 2), 8)
    return max(tile, 8)


# --------------------------------------------------------------------------- #
# Kernels
# --------------------------------------------------------------------------- #
def _adapter_proj_kernel(*refs, ln_before):
    """out = x + up(relu(down(ln(x) if ln_before else x)))   (eval-mode dropout)."""
    if ln_before:
        x_ref, wd_ref, bd_ref, wu_ref, bu_ref, lng_ref, lnb_ref, o_ref = refs
    else:
        x_ref, wd_ref, bd_ref, wu_ref, bu_ref, o_ref = refs

    x = x_ref[...].astype(jnp.float32)
    if ln_before:
        h = _layernorm(x, lng_ref[...].astype(jnp.float32),
                       lnb_ref[...].astype(jnp.float32))
    else:
        h = x

    # down projection (MXU, f32 accumulation) + bias + ReLU
    r = jnp.dot(h.astype(wd_ref.dtype), wd_ref[...],
                preferred_element_type=jnp.float32)
    r = jnp.maximum(r + bd_ref[...].astype(jnp.float32), 0.0)
    # dropout -> identity (eval mode)
    # up projection + bias
    r = jnp.dot(r.astype(wu_ref.dtype), wu_ref[...],
                preferred_element_type=jnp.float32)
    r = r + bu_ref[...].astype(jnp.float32)
    o_ref[...] = (x + r).astype(o_ref.dtype)


def _adapter_proj_blocked_kernel(*refs, ln_before):
    """Large-H path: W_up column-blocked over grid axis 1; down-proj kept in scratch."""
    if ln_before:
        (x_ref, xcol_ref, wd_ref, bd_ref, wu_ref, bu_ref, lng_ref, lnb_ref,
         o_ref, r_scr) = refs
    else:
        x_ref, xcol_ref, wd_ref, bd_ref, wu_ref, bu_ref, o_ref, r_scr = refs

    @pl.when(pl.program_id(1) == 0)
    def _():
        x = x_ref[...].astype(jnp.float32)
        if ln_before:
            h = _layernorm(x, lng_ref[...].astype(jnp.float32),
                           lnb_ref[...].astype(jnp.float32))
        else:
            h = x
        r = jnp.dot(h.astype(wd_ref.dtype), wd_ref[...],
                    preferred_element_type=jnp.float32)
        r_scr[...] = jnp.maximum(r + bd_ref[...].astype(jnp.float32), 0.0)

    rj = jnp.dot(r_scr[...].astype(wu_ref.dtype), wu_ref[...],
                 preferred_element_type=jnp.float32)
    rj = rj + bu_ref[...].astype(jnp.float32)
    o_ref[...] = (xcol_ref[...].astype(jnp.float32) + rj).astype(o_ref.dtype)


def _ln_residual_kernel(x_ref, lng_ref, lnb_ref, o_ref):
    """ln_after=True path: faithful to the PyTorch forward (residual = ln(x))."""
    x = x_ref[...].astype(jnp.float32)
    r = _layernorm(x, lng_ref[...].astype(jnp.float32),
                   lnb_ref[...].astype(jnp.float32))
    o_ref[...] = (x + r).astype(o_ref.dtype)


# --------------------------------------------------------------------------- #
# Wrapper
# --------------------------------------------------------------------------- #
def adapter_forward(x, w_down, b_down, w_up, b_up, ln_g, ln_b, *,
                    ln_before=False, ln_after=False,
                    tile_tokens=None, h_tile=None, mxu_dtype=None,
                    max_resident_weight_bytes=None):
    """x: [T, H] (f32 or bf16; output matches x.dtype).
    w_down: [H, Hd], w_up: [Hd, H] (pre-transposed), biases / LN params [1, .]."""
    T, H = x.shape
    Hd = w_down.shape[1]
    x_isz = jnp.dtype(x.dtype).itemsize

    cap = _vmem_capacity_bytes()
    budget = (cap * 3) // 4                      # ~96 MiB v5e/v6e, ~48 MiB v7x
    single_buf = _supports_single_buffering()
    w_bufs = 1 if single_buf else 2

    def _resident(shape, index_map):
        # Grid-invariant operand: fetched once; single VMEM buffer if supported.
        if single_buf:
            return pl.BlockSpec(shape, index_map, pipeline_mode=pl.Buffered(1))
        return pl.BlockSpec(shape, index_map)

    def _pad_tokens(tile):
        Tp = _round_up(max(T, 1), tile)
        x_in = jnp.pad(x, ((0, Tp - T), (0, 0))) if Tp != T else x
        return Tp, x_in

    # ----------------------------------------------------------------- #
    # ln_after=True: in the PyTorch forward, `residual` is overwritten by
    # ln(hidden_states), so the projections are dead code -> skip them.
    # ----------------------------------------------------------------- #
    if ln_after:
        per_tok = 4 * H * x_isz + 8 * H          # x/out double-buffered + f32 temps
        fixed = w_bufs * 2 * H * 4
        tile = _auto_tile(T, per_tok, fixed, budget, tile_tokens)
        Tp, x_in = _pad_tokens(tile)
        grid = (Tp // tile,)
        out = pl.pallas_call(
            _ln_residual_kernel,
            out_shape=jax.ShapeDtypeStruct((Tp, H), x.dtype),
            grid_spec=pltpu.PrefetchScalarGridSpec(
                num_scalar_prefetch=0, grid=grid,
                in_specs=[pl.BlockSpec((tile, H), lambda i: (i, 0)),
                          _resident((1, H), lambda i: (0, 0)),
                          _resident((1, H), lambda i: (0, 0))],
                out_specs=pl.BlockSpec((tile, H), lambda i: (i, 0)),
            ),
            compiler_params=pltpu.CompilerParams(
                dimension_semantics=("parallel",),
                vmem_limit_bytes=int(budget)),
            cost_estimate=_cost_estimate(
                flops=6 * Tp * H, bytes_accessed=2 * Tp * H * x_isz + 8 * H,
                transcendentals=Tp),
        )(x_in, ln_g, ln_b)
        return out[:T] if Tp != T else out

    # ----------------------------------------------------------------- #
    # Projection path. Lane/MXU-dense bottleneck: pad Hd to 128 (or 256 when
    # Hd > 128, filling the 256-wide v6e/v7x MXU).  Padding is inert: padded
    # W_down cols / b_down entries / W_up rows are zero.
    # ----------------------------------------------------------------- #
    mxu_gran = 256 if Hd > _LANE else _LANE
    Hdp = _round_up(Hd, mxu_gran)
    if Hdp != Hd:
        w_down = jnp.pad(w_down, ((0, 0), (0, Hdp - Hd)))
        b_down = jnp.pad(b_down, ((0, 0), (0, Hdp - Hd)))
        w_up = jnp.pad(w_up, ((0, Hdp - Hd), (0, 0)))
    if mxu_dtype is not None:
        w_down = w_down.astype(mxu_dtype)        # halves resident bytes / DMA if bf16
        w_up = w_up.astype(mxu_dtype)
    w_isz = jnp.dtype(w_down.dtype).itemsize

    resident_w_bytes = w_bufs * w_isz * 2 * H * Hdp
    if max_resident_weight_bytes is None:
        max_resident_weight_bytes = budget // 2
    use_blocked = (resident_w_bytes > max_resident_weight_bytes
                   and H % _LANE == 0 and H > _LANE)

    kernel_kw = dict(ln_before=ln_before)

    if not use_blocked:
        # --- weights fully resident, 1-D token grid --------------------- #
        per_tok = 4 * H * x_isz + 8 * (H + Hdp)  # x/out dbuf + f32 temps (2x headroom)
        fixed = resident_w_bytes + w_bufs * 4 * (Hdp + 3 * H)
        tile = _auto_tile(T, per_tok, fixed, budget, tile_tokens)
        Tp, x_in = _pad_tokens(tile)
        grid = (Tp // tile,)

        in_specs = [pl.BlockSpec((tile, H), lambda i: (i, 0)),
                    _resident((H, Hdp), lambda i: (0, 0)),
                    _resident((1, Hdp), lambda i: (0, 0)),
                    _resident((Hdp, H), lambda i: (0, 0)),
                    _resident((1, H), lambda i: (0, 0))]
        args = [x_in, w_down, b_down, w_up, b_up]
        if ln_before:
            in_specs += [_resident((1, H), lambda i: (0, 0)),
                         _resident((1, H), lambda i: (0, 0))]
            args += [ln_g, ln_b]

        out = pl.pallas_call(
            functools.partial(_adapter_proj_kernel, **kernel_kw),
            out_shape=jax.ShapeDtypeStruct((Tp, H), x.dtype),
            grid_spec=pltpu.PrefetchScalarGridSpec(
                num_scalar_prefetch=0, grid=grid,
                in_specs=in_specs,
                out_specs=pl.BlockSpec((tile, H), lambda i: (i, 0)),
            ),
            compiler_params=pltpu.CompilerParams(
                dimension_semantics=("parallel",),
                vmem_limit_bytes=int(budget)),
            cost_estimate=_cost_estimate(
                flops=4 * Tp * H * Hdp,
                bytes_accessed=(2 * Tp * H * x_isz + 2 * H * Hdp * w_isz
                                + 4 * (Hdp + 3 * H)),
                transcendentals=Tp if ln_before else 0),
        )(*args)
        return out[:T] if Tp != T else out

    # --- large-H fallback: W_up column-blocked over a 2nd grid axis -------- #
    wd_bytes = w_bufs * w_isz * H * Hdp
    if h_tile is None:
        avail_wu = max(budget // 2 - wd_bytes, 2 * w_isz * Hdp * _LANE)
        h_tile = _LANE
        t = _LANE
        while t <= H:
            if H % t == 0 and 2 * w_isz * Hdp * t <= avail_wu:
                h_tile = t
            t += _LANE
    else:
        h_tile = max(_LANE, (h_tile // _LANE) * _LANE)
        while H % h_tile != 0:
            h_tile -= _LANE
        h_tile = max(h_tile, _LANE)

    per_tok = (2 * H * x_isz            # full x tile (double-buffered)
               + 4 * h_tile * x_isz     # x column + out column (double-buffered)
               + 4 * Hdp                # f32 scratch for relu(down(x))
               + 8 * (H + Hdp))         # f32 temps headroom
    fixed = wd_bytes + 2 * w_isz * Hdp * h_tile + w_bufs * 4 * (Hdp + 3 * H)
    tile = _auto_tile(T, per_tok, fixed, budget, tile_tokens)
    Tp, x_in = _pad_tokens(tile)
    grid = (Tp // tile, H // h_tile)

    in_specs = [pl.BlockSpec((tile, H), lambda i, j: (i, 0)),        # full x (down/LN)
                pl.BlockSpec((tile, h_tile), lambda i, j: (i, j)),   # x cols (residual)
                _resident((H, Hdp), lambda i, j: (0, 0)),            # W_down resident
                _resident((1, Hdp), lambda i, j: (0, 0)),
                pl.BlockSpec((Hdp, h_tile), lambda i, j: (0, j)),    # W_up column block
                pl.BlockSpec((1, h_tile), lambda i, j: (0, j))]
    args = [x_in, x_in, w_down, b_down, w_up, b_up]
    if ln_before:
        in_specs += [_resident((1, H), lambda i, j: (0, 0)),
                     _resident((1, H), lambda i, j: (0, 0))]
        args += [ln_g, ln_b]

    out = pl.pallas_call(
        functools.partial(_adapter_proj_blocked_kernel, **kernel_kw),
        out_shape=jax.ShapeDtypeStruct((Tp, H), x.dtype),
        grid_spec=pltpu.PrefetchScalarGridSpec(
            num_scalar_prefetch=0, grid=grid,
            in_specs=in_specs,
            out_specs=pl.BlockSpec((tile, h_tile), lambda i, j: (i, j)),
            scratch_shapes=[pltpu.VMEM((tile, Hdp), jnp.float32)],
        ),
        compiler_params=pltpu.CompilerParams(
            dimension_semantics=("parallel", "arbitrary"),
            vmem_limit_bytes=int(budget)),
        cost_estimate=_cost_estimate(
            flops=4 * Tp * H * Hdp,
            bytes_accessed=(3 * Tp * H * x_isz + H * Hdp * w_isz
                            + (Tp // tile) * Hdp * H * w_isz),
            transcendentals=Tp if ln_before else 0),
    )(*args)
    return out[:T] if Tp != T else out


# --------------------------------------------------------------------------- #
# Params + reference
# --------------------------------------------------------------------------- #
def init_adapter_params(key, hidden_dim, ds_factor, std=0.001):
    """Matches Adapter.init_weights: normal(std) clamped to +/- 2*std."""
    hd = hidden_dim // ds_factor
    k1, k2, k3, k4 = jax.random.split(key, 4)

    def trunc(k, shape):
        return jnp.clip(std * jax.random.normal(k, shape, jnp.float32),
                        -2.0 * std, 2.0 * std)

    # PyTorch nn.Linear weight is [out, in]; store transposed [in, out] for x @ W.
    w_down = trunc(k1, (hidden_dim, hd))
    b_down = trunc(k2, (1, hd))
    w_up = trunc(k3, (hd, hidden_dim))
    b_up = trunc(k4, (1, hidden_dim))
    ln_g = jnp.ones((1, hidden_dim), jnp.float32)
    ln_b = jnp.zeros((1, hidden_dim), jnp.float32)
    return w_down, b_down, w_up, b_up, ln_g, ln_b


def adapter_reference(x, w_down, b_down, w_up, b_up, ln_g, ln_b,
                      *, ln_before=False, ln_after=False):
    h = _layernorm(x, ln_g, ln_b) if ln_before else x
    r = jnp.maximum(h @ w_down + b_down, 0.0)
    r = r @ w_up + b_up
    if ln_after:
        r = _layernorm(x, ln_g, ln_b)
    return x + r


# --------------------------------------------------------------------------- #
# Demo / self-test
# --------------------------------------------------------------------------- #
if __name__ == "__main__":
    # Small shapes consistent with the module: batch=2, seq=8, hidden=32, ds_factor=4.
    B, S, H = 2, 8, 32
    ds_factor = 4

    key = jax.random.PRNGKey(0)
    kx, kp, kp2 = jax.random.split(key, 3)
    hidden_states = jax.random.normal(kx, (B, S, H), jnp.float32)
    params = init_adapter_params(kp, H, ds_factor)
    x2d = hidden_states.reshape(B * S, H)

    configs = [
        dict(ln_before=False, ln_after=False),
        dict(ln_before=True, ln_after=False),
        dict(ln_before=False, ln_after=True),
    ]
    for cfg in configs:
        out = adapter_forward(x2d, *params, tile_tokens=8, **cfg)  # 2 grid steps
        jax.block_until_ready(out)
        ref = adapter_reference(x2d, *params, **cfg)
        assert jnp.allclose(out, ref, atol=1e-4, rtol=1e-4), f"mismatch vs reference {cfg}"

    # Auto tile sizing + ragged token count (tail padding + slicing).
    out_r = adapter_forward(x2d[:13], *params)
    jax.block_until_ready(out_r)
    ref_r = adapter_reference(x2d[:13], *params)
    assert jnp.allclose(out_r, ref_r, atol=1e-4, rtol=1e-4), "mismatch (ragged/auto-tile)"

    # bf16 activations end-to-end (dominant HBM traffic halved); weights in bf16 too.
    x_bf16 = x2d.astype(jnp.bfloat16)
    out_bf = adapter_forward(x_bf16, *params, mxu_dtype=jnp.bfloat16, ln_before=True)
    jax.block_until_ready(out_bf)
    ref_bf = adapter_reference(x_bf16.astype(jnp.float32), *params, ln_before=True)
    assert out_bf.dtype == jnp.bfloat16
    assert jnp.allclose(out_bf.astype(jnp.float32), ref_bf, atol=2e-2), "mismatch (bf16)"

    # Column-blocked W_up fallback (the large-H / v7x 64 MiB path), forced at a
    # small shape via max_resident_weight_bytes=0.
    H2 = 256
    params2 = init_adapter_params(kp2, H2, ds_factor)
    x_big = jax.random.normal(kx, (16, H2), jnp.float32)
    for lb in (False, True):
        out_b = adapter_forward(x_big, *params2, ln_before=lb,
                                tile_tokens=8, h_tile=128,
                                max_resident_weight_bytes=0)
        jax.block_until_ready(out_b)
        ref_b = adapter_reference(x_big, *params2, ln_before=lb)
        assert jnp.allclose(out_b, ref_b, atol=1e-4, rtol=1e-4), \
            f"mismatch vs reference (blocked, ln_before={lb})"

    out3d = adapter_forward(x2d, *params, tile_tokens=8).reshape(B, S, H)
    jax.block_until_ready(out3d)

    print("KERNEL_OK")
</pallas_src>

<mosaic_0001>
module attributes {stable_mosaic.version = 11 : i64} {
  func.func @_adapter_proj_kernel(%arg0: i32, %arg1: memref<8x32xf32, #tpu.memory_space<vmem>>, %arg2: memref<32x128xf32, #tpu.memory_space<vmem>>, %arg3: memref<1x128xf32, #tpu.memory_space<vmem>>, %arg4: memref<128x32xf32, #tpu.memory_space<vmem>>, %arg5: memref<1x32xf32, #tpu.memory_space<vmem>>, %arg6: memref<8x32xf32, #tpu.memory_space<vmem>>) attributes {dimension_semantics = [#tpu.dimension_semantics<parallel>], iteration_bounds = array<i64: 2>, scalar_prefetch = 0 : i64, scratch_operands = 0 : i64, tpu.core_type = #tpu.core_type<tc>, window_params = [{transform_indices = @transform_0, window_bounds = array<i64: 8, 32>}, {pipeline_mode = #tpu.pipeline_mode<synchronous>, transform_indices = @transform_1, window_bounds = array<i64: 32, 128>}, {pipeline_mode = #tpu.pipeline_mode<synchronous>, transform_indices = @transform_2, window_bounds = array<i64: 1, 128>}, {pipeline_mode = #tpu.pipeline_mode<synchronous>, transform_indices = @transform_3, window_bounds = array<i64: 128, 32>}, {pipeline_mode = #tpu.pipeline_mode<synchronous>, transform_indices = @transform_4, window_bounds = array<i64: 1, 32>}, {transform_indices = @transform_5, window_bounds = array<i64: 8, 32>}]} {
    %c0 = arith.constant 0 : index
    %c0_0 = arith.constant 0 : index
    %0 = vector.load %arg1[%c0, %c0_0] : memref<8x32xf32, #tpu.memory_space<vmem>>, vector<8x32xf32>
    %c0_1 = arith.constant 0 : index
    %c0_2 = arith.constant 0 : index
    %1 = vector.load %arg2[%c0_1, %c0_2] : memref<32x128xf32, #tpu.memory_space<vmem>>, vector<32x128xf32>
    %cst = arith.constant dense<0.000000e+00> : vector<8x128xf32>
    %2 = tpu.matmul %0, %1, %cst {dimension_numbers = #tpu.dot_dimension_numbers<[1], [0], [0], [1], [0, 0, 1, 1], [], []>} : vector<8x32xf32>, vector<32x128xf32>, vector<8x128xf32> -> vector<8x128xf32>
    %c0_3 = arith.constant 0 : index
    %c0_4 = arith.constant 0 : index
    %3 = vector.load %arg3[%c0_3, %c0_4] : memref<1x128xf32, #tpu.memory_space<vmem>>, vector<1x128xf32>
    %4 = vector.broadcast %3 : vector<1x128xf32> to vector<8x128xf32>
    %5 = arith.addf %2, %4 : vector<8x128xf32>
    %cst_5 = arith.constant 0.000000e+00 : f32
    %6 = vector.broadcast %cst_5 : f32 to vector<8x128xf32>
    %7 = arith.maximumf %5, %6 : vector<8x128xf32>
    %c0_6 = arith.constant 0 : index
    %c0_7 = arith.constant 0 : index
    %8 = vector.load %arg4[%c0_6, %c0_7] : memref<128x32xf32, #tpu.memory_space<vmem>>, vector<128x32xf32>
    %cst_8 = arith.constant dense<0.000000e+00> : vector<8x32xf32>
    %9 = tpu.matmul %7, %8, %cst_8 {dimension_numbers = #tpu.dot_dimension_numbers<[1], [0], [0], [1], [0, 0, 1, 1], [], []>} : vector<8x128xf32>, vector<128x32xf32>, vector<8x32xf32> -> vector<8x32xf32>
    %c0_9 = arith.constant 0 : index
    %c0_10 = arith.constant 0 : index
    %10 = vector.load %arg5[%c0_9, %c0_10] : memref<1x32xf32, #tpu.memory_space<vmem>>, vector<1x32xf32>
    %11 = vector.broadcast %10 : vector<1x32xf32> to vector<8x32xf32>
    %12 = arith.addf %9, %11 : vector<8x32xf32>
    %13 = arith.addf %0, %12 : vector<8x32xf32>
    %c0_11 = arith.constant 0 : index
    %c0_12 = arith.constant 0 : index
    %14 = vector.load %arg6[%c0_11, %c0_12] : memref<8x32xf32, #tpu.memory_space<vmem>>, vector<8x32xf32>
    tpu.vector_store %arg6[%c0_11, %c0_12], %13 {strides = array<i32>} : memref<8x32xf32, #tpu.memory_space<vmem>>, vector<8x32xf32>,
    return
  }
  func.func @transform_0(%arg0: i32) -> (i32, i32) {
    %c0_i32 = arith.constant 0 : i32
    %c0_i32_0 = arith.constant 0 : i32
    return %arg0, %c0_i32 : i32, i32
  }
  func.func @transform_1(%arg0: i32) -> (i32, i32) {
    %c0_i32 = arith.constant 0 : i32
    %c0_i32_0 = arith.constant 0 : i32
    %c0_i32_1 = arith.constant 0 : i32
    return %c0_i32, %c0_i32_0 : i32, i32
  }
  func.func @transform_2(%arg0: i32) -> (i32, i32) {
    %c0_i32 = arith.constant 0 : i32
    %c0_i32_0 = arith.constant 0 : i32
    %c0_i32_1 = arith.constant 0 : i32
    return %c0_i32, %c0_i32_0 : i32, i32
  }
  func.func @transform_3(%arg0: i32) -> (i32, i32) {
    %c0_i32 = arith.constant 0 : i32
    %c0_i32_0 = arith.constant 0 : i32
    %c0_i32_1 = arith.constant 0 : i32
    return %c0_i32, %c0_i32_0 : i32, i32
  }
  func.func @transform_4(%arg0: i32) -> (i32, i32) {
    %c0_i32 = arith.constant 0 : i32
    %c0_i32_0 = arith.constant 0 : i32
    %c0_i32_1 = arith.constant 0 : i32
    return %c0_i32, %c0_i32_0 : i32, i32
  }
  func.func @transform_5(%arg0: i32) -> (i32, i32) {
    %c0_i32 = arith.constant 0 : i32
    %c0_i32_0 = arith.constant 0 : i32
    return %arg0, %c0_i32 : i32, i32
  }
}

</mosaic_0001>

<bundles_post_ra>
// kernel: tpu_custom_call.1
= control target key start
LH: loop header
LB: loop body
LE: loop exit
PB: predicated region body
PF: predicated region fallthrough
CT: control target
= control target key end

     0   :  { %10 = vsyncpa [#allocation3], 0  ;;  %s894_s0 = inlined_call_operand.vmem [shape: f32[16,32], index: 0, kind: input, shape index: {}]   ;;  %s895_s1 = inlined_call_operand.vmem [shape: f32[32,128], index: 1, kind: input, shape index: {}]   ;;  %s896_s2 = inlined_call_operand.vmem [shape: f32[1,128], index: 2, kind: input, shape index: {}]   ;;  %s897_s3 = inlined_call_operand.vmem [shape: f32[128,32], index: 3, kind: input, shape index: {}]   ;;  %s898_s4 = inlined_call_operand.vmem [shape: f32[1,32], index: 4, kind: input, shape index: {}]   ;;  %s899_s5 = inlined_call_operand.hbm [shape: f32[16,32], index: 5, kind: output, shape index: {}]  }
   0x1   :  { %12 = vsyncpa [#allocation3 + $0x1], 0  ;;  %s726_s18 = smov 0   ;;  %s728_s19 = smov 0  }
   0x2   :  { %s730_s20 = smov 0   ;;  %s732_s21 = smov 0  }
   0x3 LB: > { %s747_s22 = sadd.s32 4294967295, %s690_s21   ;;  %s475_s23 = sadd.s32 4294967294, %s690_s21   ;;  %s690_s21 = sphi %s732_s21, %s905_s21   ;;  %s686_s20 = sphi %s730_s20, %s904_s20   ;;  %s682_s19 = sphi %s728_s19, %s903_s19   ;;  %s678_s18 = sphi %s726_s18, %s902_s18  }
   0x4   : > { %s751_s24 = sadd.s32 1, %s690_s21   ;;  %s135_s25 = sadd.s32 1, %s686_s20 }
   0x5   : > { %s132_s26 = ssub.s32 %s690_s21, %s751_s24  ;;  %p145_p0 = scmp.ne.s32.totalorder %s686_s20, %s682_s19 }
   0x6   : > { %p133_p1 = scmp.eq.s32.totalorder %s132_s26, 0  ;;  %p146_p2 = scmp.eq.s32.totalorder %s747_s22, 1 }
   0x7   : > { %p151_p3 = scmp.ne.s32.totalorder %s682_s19, %s678_s18  ;;  %p152_p4 = scmp.eq.s32.totalorder %s475_s23, 1 }
   0x8   : > { %s762_s27 = scalar_select %p133_p1, %s686_s20, %s135_s25  }
   0x9   : > { %p764_p5 = por %p146_p2, %p145_p0  ;;  %p768_p6 = por %p152_p4, %p151_p3 }
   0xa   : > { %p478_p7 = scmp.ge.s32.totalorder %s690_s21, 1  ;;  %p189_p8 = scmp.lt.s32.totalorder %s690_s21, 3 }
   0xc   : > { %p190_p9 = pnand %p478_p7, %p189_p8 }
   0xd   : > { %v221_v0 = vld [vmem:[%s895_s1] sm:$0xff] (!%p190_p9)  ;;  %v222_v1 = vld [vmem:[%s895_s1 + $0x8] sm:$0xff] (!%p190_p9)  ;;  %v223_v2 = vld [vmem:[%s895_s1 + $0x10] sm:$0xff] (!%p190_p9)  ;;  %v692_v3 = vmov (!%p190_p9), 0.0|0.0   ;;  %vm693_vm0 = vmmov (!%p190_p9), 0   ;;  %v694_v6 = vmov (!%p190_p9), 0.0  }
   0xe   : > { %193 = sbr.rel (%p190_p9) target bundleno = 472 (0x1d8), region = 40  ;;  %556 = vmatprep.subr.bf16.mxu0 (!%p190_p9), %v692_v3  ;;  %v557_v4 = vpack.c.bf16 (!%p190_p9), %v222_v1, %v221_v0  ;;  %v224_v5 = vld [vmem:[%s895_s1 + $0x18] sm:$0xff] (!%p190_p9)  ;;  %518 = vmatprep.mubr.msk.f32.mxu0 (!%p190_p9), %vm693_vm0, %v694_v6  ;;  %p216_p10 = scmp.lt.s32.totalorder (!%p190_p9), %s747_s22, 1  ;;  %v307_v7 = vld [vmem:[%s897_s3] sm:$0xff] (!%p190_p9)  ;;  %v308_v8 = vld [vmem:[%s897_s3 + $0x8] sm:$0xff] (!%p190_p9)  ;;  %vm232_vm1 = vcmask (!%p190_p9), 261120  }
   0xf   : > { %562 = vmatprep.subr.bf16.mxu1 (!%p190_p9), %v692_v3  ;;  %v563_v9 = vpack.c.bf16 (!%p190_p9), %v308_v8, %v307_v7  ;;  %v309_v10 = vld [vmem:[%s897_s3 + $0x10] sm:$0xff] (!%p190_p9)  ;;  %v310_v11 = vld [vmem:[%s897_s3 + $0x18] sm:$0xff] (!%p190_p9)  ;;  %553 = vmatprep.mubr.msk.f32.mxu1 (!%p190_p9), %vm693_vm0, %v694_v6  ;;  %v560_v12 = vpack.c.bf16 (!%p190_p9), %v224_v5, %v223_v2  ;;  %v311_v14 = vld [vmem:[%s897_s3 + $0x20] sm:$0xff] (!%p190_p9)  ;;  %s213_s26 = sand.u32 (!%p190_p9), 1, %s682_s19   ;;  %s485_s8 = sshll.u32 (!%p190_p9), %s747_s22, 7 }
  0x10   : > { %558 = vmatpush3.bf16.msra.mxu0 (!%p190_p9), %v557_v4  ;;  %v566_v13 = vpack.c.bf16 (!%p190_p9), %v310_v11, %v309_v10  ;;  %v312_v15 = vld [vmem:[%s897_s3 + $0x28] sm:$0xff] (!%p190_p9)  ;;  %v313_v18 = vld [vmem:[%s897_s3 + $0x30] sm:$0xff] (!%p190_p9)  ;;  %v314_v19 = vld [vmem:[%s897_s3 + $0x38] sm:$0xff] (!%p190_p9)  ;;  %s403_s14 = scalar_lea.sflag (!%p190_p9), [#allocation3], %s213_s26 }
  0x11   : > { %559 = vmatprep.subr.bf16.mxu0 (!%p190_p9), %v692_v3  ;;  %564 = vmatpush3.bf16.msra.mxu1 (!%p190_p9), %v563_v9  ;;  %v569_v17 = vpack.c.bf16 (!%p190_p9), %v312_v15, %v311_v14  ;;  %v572_v20 = vpack.c.bf16 (!%p190_p9), %v314_v19, %v313_v18  ;;  %v315_v21 = vld [vmem:[%s897_s3 + $0x40] sm:$0xff] (!%p190_p9)  ;;  %v316_v22 = vld [vmem:[%s897_s3 + $0x48] sm:$0xff] (!%p190_p9)  ;;  %v317_v24 = vld [vmem:[%s897_s3 + $0x50] sm:$0xff] (!%p190_p9) }
  0x12   : > { %565 = vmatprep.subr.bf16.mxu1 (!%p190_p9), %v692_v3  ;;  %v575_v23 = vpack.c.bf16 (!%p190_p9), %v316_v22, %v315_v21  ;;  %v318_v25 = vld [vmem:[%s897_s3 + $0x58] sm:$0xff] (!%p190_p9)  ;;  %v319_v27 = vld [vmem:[%s897_s3 + $0x60] sm:$0xff] (!%p190_p9)  ;;  %v320_v28 = vld [vmem:[%s897_s3 + $0x68] sm:$0xff] (!%p190_p9) }
  0x13   : > { %v578_v26 = vpack.c.bf16 (!%p190_p9), %v318_v25, %v317_v24  ;;  %v581_v29 = vpack.c.bf16 (!%p190_p9), %v320_v28, %v319_v27  ;;  %v321_v30 = vld [vmem:[%s897_s3 + $0x70] sm:$0xff] (!%p190_p9)  ;;  %v322_v31 = vld [vmem:[%s897_s3 + $0x78] sm:$0xff] (!%p190_p9)  ;;  %v481_v33 = vld [vmem:[%s896_s2] ss:$0 sm:$0xff] (!%p190_p9) }
  0x14   : > { %561 = vmatpush3.bf16.msra.mxu0 (!%p190_p9), %v560_v12  ;;  %v584_v32 = vpack.c.bf16 (!%p190_p9), %v322_v31, %v321_v30  ;;  %v483_v38 = vld [vmem:[%s898_s4] ss:$0 sm:$0xff] (!%p190_p9) }
  0x15   : > { %s217_s30 = scalar_select %p216_p10, %s747_s22, 1  ;;  %567 = vmatpush3.bf16.msra.mxu1 %v566_v13 }
  0x16   : > { %568 = vmatprep.subr.bf16.mxu1 %v692_v3  ;;  %s695_s22 = smov [#allocation2]  }
  0x17   : > { %s480_s6 = sshll.u32 %s217_s30, 3  ;;  %s479_s30 = sshll.u32 %s213_s26, 3 }
  0x18   : > { %s219_s13 = scalar_lea.vmem %s894_s0, %s480_s6  ;;  %s215_s9 = scalar_lea.vmem [#allocation2], %s479_s30 }
  0x19   : > { %v220_v16 = vld [vmem:[%s219_s13] sm:$0xff]  ;;  %570 = vmatpush3.bf16.msra.mxu1 %v569_v17  ;;  %s416_s10 = sshll.u32 %s215_s9, 4  ;;  %s851_s13 = scalar_lea.hbm %s899_s5, %s485_s8  ;;  %s853_s10 = int_to_ptr.vmem [resolvable:$true] %s416_s10 }
  0x1a   : > { %519 = vmatmul.mubr.msk.f32.vlgmr.msra.gmra.mrb[0].mxu0 %vm232_vm1, %v220_v16  ;;  %571 = vmatprep.subr.bf16.mxu1 %v692_v3  ;;  %s628_s15 = scalar_lea.vmem %s853_s10, 128  ;;  %s632_s16 = sshll.u32 %s695_s22, 4  ;;  %s633_s16 = int_to_ptr.vmem [resolvable:$false] %s632_s16 }
  0x1b   : > { %p629_p11 = scmp.ne.s32.totalorder %s853_s10, %s628_s15  ;;  %s634_s17 = scalar_lea.vmem %s633_s16, 256 }
  0x1c   : > { %p635_p0 = scmp.lt.s32.totalorder %s853_s10, %s633_s16  ;;  %p636_p1 = scmp.lt.s32.totalorder %s634_s17, %s628_s15 }
  0x1d   : > { %573 = vmatpush3.bf16.msra.mxu1 %v572_v20  ;;  %p630_p12 = pnand %p629_p11, %p764_p5 }
  0x1e   : > { %574 = vmatprep.subr.bf16.mxu1 %v692_v3  ;;  %p637_p2 = por %p636_p1, %p635_p0 }
  0x1f   : > { %p631_p13 = pneg %p630_p12 }
  0x21   : > { %576 = vmatpush3.bf16.msra.mxu1 %v575_v23  ;;  %p638_p3 = pnand %p637_p2, %p631_p13 }
  0x22   : > { %577 = vmatprep.subr.bf16.mxu1 %v692_v3 }
  0x25   : > { %579 = vmatpush3.bf16.msra.mxu1 %v578_v26 }
  0x26   : > { %580 = vmatprep.subr.bf16.mxu1 %v692_v3 }
  0x29   : > { %582 = vmatpush3.bf16.msra.mxu1 %v581_v29 }
  0x2a   : > { %583 = vmatprep.subr.bf16.mxu1 %v692_v3 }
  0x2d   : > { %585 = vmatpush3.bf16.msra.mxu1 %v584_v32 }
  0xed   : > { %v302_v34 = vpop.f32.mrb[0].mxu0 }
  0xee   : > { %v303_v35 = vadd.f32 %v481_v33, %v302_v34  ;;  %v520_v36 = vpop.f32.mrb[1].mxu0 }
  0xf0   : > { %v306_v37 = vmax.f32 %v303_v35, 0.0 }
  0xf2   : > { %554 = vmatmul.mubr.f32.vlgmr.msra.gmra.mrb[0].mxu1 %v306_v37 }
 0x1c5   : > { %v396_v39 = vpop.f32.mrb[0].mxu1 }
 0x1c6   : > { %v397_v40 = vadd.f32 %v483_v38, %v396_v39  ;;  %v555_v41 = vpop.f32.mrb[1].mxu1 }
 0x1c8   : > { %v400_v42 = vadd.f32 %v397_v40, %v220_v16 }
 0x1ca   : > { %401 = vst.msk [vmem:[%s215_s9] sm:$0xff] %vm232_vm1, %v400_v42 }
 0x1cb   : > { %641 = shalt.err (!%p638_p3)
}
 0x1cc   : > { %s642_s23 = scalar_lea.hbm %s851_s13, 128  ;;  %s646_s30 = scalar_lea.hbm %s899_s5, 256 }
 0x1cd   : > { %p643_p4 = scmp.ne.s32.totalorder %s851_s13, %s642_s23  ;;  %p647_p9 = scmp.lt.u32.totalorder %s851_s13, %s899_s5 }
 0x1ce   : > { %p648_p10 = scmp.lt.u32.totalorder %s646_s30, %s642_s23  ;;  %p650_p12 = scmp.lt.u32.totalorder %s642_s23, %s851_s13 }
 0x1cf   : > { %p644_p7 = pnand %p643_p4, %p764_p5 }
 0x1d0   : > { %p649_p11 = por %p648_p10, %p647_p9 }
 0x1d1   : > { %p645_p8 = pneg %p644_p7 }
 0x1d2   : > { %p651_p13 = por %p650_p12, %p649_p11 }
 0x1d4   : > { %p652_p0 = pnand %p651_p13, %p645_p8 }
 0x1d6   : > { %655 = shalt.err (!%p652_p0)
}
 0x1d7   : > { %586 = dma.vmem_to_hbm [thread:$0]  (%p764_p5), %s853_s10, 128, %s851_s13, %s403_s14  }
 0x1d8 PF: > { %p592_p1 = scmp.ge.s32.totalorder %s690_s21, 2  ;;  %s428_s8 = sand.u32 1, %s678_s18  }
 0x1d9   : > { %s429_s9 = scalar_lea.sflag [#allocation3], %s428_s8 }
 0x1da   : > { %p589_p2 = pnand %p592_p1, %p768_p6 }
 0x1dc   : > { %673 = dma.done.wait (!%p589_p2), %s429_s9, 128  }
 0x1dd   : > { %675 = vsyncadd (!%p589_p2), %s429_s9, 4294967168  ;;  %p15_p3 = scmp.ge.s32.totalorder %s751_s24, 4   ;;  %s902_s18 = smov %s682_s19 }
 0x1de   : > { %s903_s19 = smov %s686_s20  ;;  %s904_s20 = smov %s762_s27 }
 0x1df   : > { %s905_s21 = smov %s751_s24  ;;  %17 = sbr.rel (!%p15_p3) target bundleno = 3 (0x3), region = 75 }
 0x1e6   :  { %434 = vsyncpa [#allocation3], 1 }
 0x1e7   :  { %436 = vsyncpa [#allocation3 + $0x1], 1 }

</bundles_post_ra>
